<compile_context>
chip_gen: v5e
topology: v5e:2x2
jax: 0.10.0
libtpu: 0.0.40
codegen_flags: <defaults>
</compile_context>

<pallas_src>
import jax
import jax.numpy as jnp
from jax.experimental import pallas as pl
from jax.experimental.pallas import tpu as pltpu

GAMMA = 0.9
ALPHA = 1.0 / (1.0 - GAMMA)   # ScaleLayer alpha = 10.0
BN_EPS = 1e-5
_SLAB_ROWS = 16               # 10 rows used (b1,g1,be1,b2,g2,be2,b3,g3,be3,b4), sublane-padded


def _round_up(v, m):
    return (v + m - 1) // m * m


def _dqn_kernel(x_ref, w1_ref, w2_ref, w3_ref, w4_ref, vec_ref, out_ref):
    """Fused MLP forward: 3x (Linear + BatchNorm(train) + ReLU), Linear, tanh, scale."""
    batch = x_ref.shape[0]
    inv_b = jnp.float32(1.0 / batch)
    vec = vec_ref[...]                      # (16, Dmax) packed bias/gamma/beta slab

    def linear_bn_relu(h, w_ref, row):
        d = w_ref.shape[1]                  # static, lane-aligned (multiple of 128)
        b = vec[row:row + 1, :d]
        g = vec[row + 1:row + 2, :d]
        be = vec[row + 2:row + 3, :d]
        # Linear: (B, Din) @ (Din, D) + (1, D)   — MXU, f32 accumulate.
        z = jnp.dot(h, w_ref[...], preferred_element_type=jnp.float32) + b
        # BatchNorm1d (training mode) — one-pass batch mean / biased variance.
        s1 = jnp.sum(z, axis=0, keepdims=True)
        s2 = jnp.sum(z * z, axis=0, keepdims=True)
        mean = s1 * inv_b
        var = jnp.maximum(s2 * inv_b - mean * mean, 0.0)   # clamp: cancellation safety
        zn = (z - mean) * jax.lax.rsqrt(var + BN_EPS)      # EUP rsqrt
        return jnp.maximum(zn * g + be, 0.0)               # affine + ReLU

    h = x_ref[...].astype(jnp.float32)
    h = linear_bn_relu(h, w1_ref, 0)
    h = linear_bn_relu(h, w2_ref, 3)
    h = linear_bn_relu(h, w3_ref, 6)
    # Final Linear -> tanh -> scale by alpha = 1/(1-GAMMA). Padded lanes stay 0.
    d4 = w4_ref.shape[1]
    z = jnp.dot(h, w4_ref[...], preferred_element_type=jnp.float32) + vec[9:10, :d4]
    out_ref[...] = (ALPHA * jnp.tanh(z)).astype(out_ref.dtype)


def pack_params(params):
    """Pad every feature dim to its own lane-dense multiple of 128 and pack the
    ten per-feature vectors into one (16, Dmax) slab. Done once, off the hot path.
    Padding is exact: padded weight columns / bias / gamma / beta are 0, so the
    padded lanes stay identically 0 through BN, ReLU and tanh."""
    (w1, b1, g1, be1, w2, b2, g2, be2, w3, b3, g3, be3, w4, b4) = params
    n_states, n = w1.shape
    n_actions = w4.shape[1]
    d0 = _round_up(n_states, 128)
    d1 = _round_up(n, 128)
    d2 = _round_up(4 * n, 128)
    d3 = _round_up(n, 128)
    d4 = _round_up(n_actions, 128)
    dmax = max(d1, d2, d3, d4)

    def pad2(a, rows, cols):
        a = a.astype(jnp.float32)
        return jnp.pad(a, ((0, rows - a.shape[0]), (0, cols - a.shape[1])))

    w1p = pad2(w1, d0, d1)
    w2p = pad2(w2, d1, d2)
    w3p = pad2(w3, d2, d3)
    w4p = pad2(w4, d3, d4)
    rows = [b1, g1, be1, b2, g2, be2, b3, g3, be3, b4]
    slab = jnp.concatenate([pad2(r, 1, dmax) for r in rows], axis=0)
    slab = jnp.pad(slab, ((0, _SLAB_ROWS - slab.shape[0]), (0, 0)))
    return {"w1": w1p, "w2": w2p, "w3": w3p, "w4": w4p, "vecs": slab,
            "n_actions": int(n_actions), "d0": int(d0), "d4": int(d4)}


def dqn_forward(x, packed):
    """x: (B, n_states) f32.  packed: output of pack_params()."""
    batch, n_states = x.shape
    d0 = packed["d0"]
    d4 = packed["d4"]
    n_actions = packed["n_actions"]
    xp = jnp.pad(x.astype(jnp.float32), ((0, 0), (0, d0 - n_states)))

    vmem = pl.BlockSpec(memory_space=pltpu.MemorySpace.VMEM)
    w_shapes = [packed[k].shape for k in ("w1", "w2", "w3", "w4")]
    flops = int(sum(2 * batch * a * b for a, b in w_shapes))            # 4 matmuls
    transcendentals = int(sum(b for _, b in w_shapes[:3]) + batch * d4)  # 3x rsqrt rows + tanh
    bytes_accessed = int(4 * (batch * (d0 + d4)
                              + sum(a * b for a, b in w_shapes)
                              + _SLAB_ROWS * packed["vecs"].shape[1]))

    out = pl.pallas_call(
        _dqn_kernel,
        out_shape=jax.ShapeDtypeStruct((batch, d4), jnp.float32),
        in_specs=[vmem] * 6,
        out_specs=vmem,
        compiler_params=pltpu.CompilerParams(vmem_limit_bytes=32 * 1024 * 1024),
        cost_estimate=pl.CostEstimate(flops=flops,
                                      transcendentals=transcendentals,
                                      bytes_accessed=bytes_accessed),
    )(xp, packed["w1"], packed["w2"], packed["w3"], packed["w4"], packed["vecs"])
    return out[:, :n_actions]               # drop lane padding


def init_params(key, n_states, n_actions):
    """Deterministic synthetic parameters matching create_model(n_states, n_actions)."""
    n = 32 if n_states <= 12 else 64
    dims = [(n_states, n), (n, 4 * n), (4 * n, n), (n, n_actions)]
    keys = jax.random.split(key, 8)
    params = []
    for i, (fin, fout) in enumerate(dims):
        # Linear weight stored as (in, out) — i.e. PyTorch weight.T — plus bias as (1, out).
        w = (jax.random.normal(keys[2 * i], (fin, fout), jnp.float32)
             * (1.0 / jnp.sqrt(jnp.float32(fin))))
        b = (jax.random.normal(keys[2 * i + 1], (1, fout), jnp.float32) * 0.01)
        params.append(w)
        params.append(b)
        if i < 3:
            # BatchNorm affine params (PyTorch default init: gamma=1, beta=0).
            params.append(jnp.ones((1, fout), jnp.float32))
            params.append(jnp.zeros((1, fout), jnp.float32))
    return tuple(params)


def reference_forward(x, params):
    """Plain-JAX reference of the same forward (for a sanity check)."""
    (w1, b1, g1, be1, w2, b2, g2, be2, w3, b3, g3, be3, w4, b4) = params

    def lbr(h, w, b, g, be):
        z = h @ w + b
        mean = jnp.mean(z, axis=0, keepdims=True)
        var = jnp.mean((z - mean) ** 2, axis=0, keepdims=True)
        zn = (z - mean) / jnp.sqrt(var + BN_EPS) * g + be
        return jnp.maximum(zn, 0.0)

    h = lbr(x, w1, b1, g1, be1)
    h = lbr(h, w2, b2, g2, be2)
    h = lbr(h, w3, b3, g3, be3)
    return ALPHA * jnp.tanh(h @ w4 + b4)


if __name__ == "__main__":
    n_states = 8      # <= 12  =>  hidden n = 32
    n_actions = 4
    batch = 8         # BN(train) needs batch > 1; 8 keeps the sublane dim dense.

    key = jax.random.PRNGKey(0)
    kx, kp = jax.random.split(key)
    x = jax.random.normal(kx, (batch, n_states), jnp.float32)
    params = init_params(kp, n_states, n_actions)
    packed = pack_params(params)

    out = dqn_forward(x, packed)
    out = jax.block_until_ready(out)

    ref = reference_forward(x, params)
    assert out.shape == (batch, n_actions)
    assert jnp.allclose(out, ref, atol=1e-3, rtol=1e-3), "mismatch vs reference"

    print("KERNEL_OK")
</pallas_src>

<mosaic_0001>
module attributes {stable_mosaic.version = 11 : i64} {
  func.func @_dqn_kernel(%arg0: memref<8x128xf32, #tpu.memory_space<vmem>>, %arg1: memref<128x128xf32, #tpu.memory_space<vmem>>, %arg2: memref<128x128xf32, #tpu.memory_space<vmem>>, %arg3: memref<128x128xf32, #tpu.memory_space<vmem>>, %arg4: memref<128x128xf32, #tpu.memory_space<vmem>>, %arg5: memref<16x128xf32, #tpu.memory_space<vmem>>, %arg6: memref<8x128xf32, #tpu.memory_space<vmem>>) attributes {dimension_semantics = [], scalar_prefetch = 0 : i64, scratch_operands = 0 : i64, tpu.core_type = #tpu.core_type<tc>} {
    %c0 = arith.constant 0 : index
    %c0_0 = arith.constant 0 : index
    %0 = vector.load %arg5[%c0, %c0_0] : memref<16x128xf32, #tpu.memory_space<vmem>>, vector<16x128xf32>
    %c0_1 = arith.constant 0 : index
    %c0_2 = arith.constant 0 : index
    %1 = vector.load %arg0[%c0_1, %c0_2] : memref<8x128xf32, #tpu.memory_space<vmem>>, vector<8x128xf32>
    %2 = vector.extract_strided_slice %0 {offsets = [0, 0], sizes = [1, 128], strides = [1, 1]} : vector<16x128xf32> to vector<1x128xf32>
    %3 = vector.extract_strided_slice %0 {offsets = [1, 0], sizes = [1, 128], strides = [1, 1]} : vector<16x128xf32> to vector<1x128xf32>
    %4 = vector.extract_strided_slice %0 {offsets = [2, 0], sizes = [1, 128], strides = [1, 1]} : vector<16x128xf32> to vector<1x128xf32>
    %c0_3 = arith.constant 0 : index
    %c0_4 = arith.constant 0 : index
    %5 = vector.load %arg1[%c0_3, %c0_4] : memref<128x128xf32, #tpu.memory_space<vmem>>, vector<128x128xf32>
    %cst = arith.constant dense<0.000000e+00> : vector<8x128xf32>
    %6 = tpu.matmul %1, %5, %cst {dimension_numbers = #tpu.dot_dimension_numbers<[1], [0], [0], [1], [0, 0, 1, 1], [], []>} : vector<8x128xf32>, vector<128x128xf32>, vector<8x128xf32> -> vector<8x128xf32>
    %7 = vector.broadcast %2 : vector<1x128xf32> to vector<8x128xf32>
    %8 = arith.addf %6, %7 : vector<8x128xf32>
    %cst_5 = arith.constant dense<0.000000e+00> : vector<128xf32>
    %9 = vector.multi_reduction <add>, %8, %cst_5 [0] : vector<8x128xf32> to vector<128xf32>
    %10 = vector.shape_cast %9 : vector<128xf32> to vector<1x128xf32>
    %11 = arith.mulf %8, %8 : vector<8x128xf32>
    %cst_6 = arith.constant dense<0.000000e+00> : vector<128xf32>
    %12 = vector.multi_reduction <add>, %11, %cst_6 [0] : vector<8x128xf32> to vector<128xf32>
    %13 = vector.shape_cast %12 : vector<128xf32> to vector<1x128xf32>
    %cst_7 = arith.constant 1.250000e-01 : f32
    %14 = vector.broadcast %cst_7 : f32 to vector<1x128xf32>
    %15 = arith.mulf %10, %14 : vector<1x128xf32>
    %cst_8 = arith.constant 1.250000e-01 : f32
    %16 = vector.broadcast %cst_8 : f32 to vector<1x128xf32>
    %17 = arith.mulf %13, %16 : vector<1x128xf32>
    %18 = arith.mulf %15, %15 : vector<1x128xf32>
    %19 = arith.subf %17, %18 : vector<1x128xf32>
    %cst_9 = arith.constant 0.000000e+00 : f32
    %20 = vector.broadcast %cst_9 : f32 to vector<1x128xf32>
    %21 = arith.maximumf %19, %20 : vector<1x128xf32>
    %22 = vector.broadcast %15 : vector<1x128xf32> to vector<8x128xf32>
    %23 = arith.subf %8, %22 : vector<8x128xf32>
    %cst_10 = arith.constant 9.99999974E-6 : f32
    %24 = vector.broadcast %cst_10 : f32 to vector<1x128xf32>
    %25 = arith.addf %21, %24 : vector<1x128xf32>
    %26 = math.rsqrt %25 : vector<1x128xf32>
    %27 = vector.broadcast %26 : vector<1x128xf32> to vector<8x128xf32>
    %28 = arith.mulf %23, %27 : vector<8x128xf32>
    %29 = vector.broadcast %3 : vector<1x128xf32> to vector<8x128xf32>
    %30 = arith.mulf %28, %29 : vector<8x128xf32>
    %31 = vector.broadcast %4 : vector<1x128xf32> to vector<8x128xf32>
    %32 = arith.addf %30, %31 : vector<8x128xf32>
    %cst_11 = arith.constant 0.000000e+00 : f32
    %33 = vector.broadcast %cst_11 : f32 to vector<8x128xf32>
    %34 = arith.maximumf %32, %33 : vector<8x128xf32>
    %35 = vector.extract_strided_slice %0 {offsets = [3, 0], sizes = [1, 128], strides = [1, 1]} : vector<16x128xf32> to vector<1x128xf32>
    %36 = vector.extract_strided_slice %0 {offsets = [4, 0], sizes = [1, 128], strides = [1, 1]} : vector<16x128xf32> to vector<1x128xf32>
    %37 = vector.extract_strided_slice %0 {offsets = [5, 0], sizes = [1, 128], strides = [1, 1]} : vector<16x128xf32> to vector<1x128xf32>
    %c0_12 = arith.constant 0 : index
    %c0_13 = arith.constant 0 : index
    %38 = vector.load %arg2[%c0_12, %c0_13] : memref<128x128xf32, #tpu.memory_space<vmem>>, vector<128x128xf32>
    %cst_14 = arith.constant dense<0.000000e+00> : vector<8x128xf32>
    %39 = tpu.matmul %34, %38, %cst_14 {dimension_numbers = #tpu.dot_dimension_numbers<[1], [0], [0], [1], [0, 0, 1, 1], [], []>} : vector<8x128xf32>, vector<128x128xf32>, vector<8x128xf32> -> vector<8x128xf32>
    %40 = vector.broadcast %35 : vector<1x128xf32> to vector<8x128xf32>
    %41 = arith.addf %39, %40 : vector<8x128xf32>
    %cst_15 = arith.constant dense<0.000000e+00> : vector<128xf32>
    %42 = vector.multi_reduction <add>, %41, %cst_15 [0] : vector<8x128xf32> to vector<128xf32>
    %43 = vector.shape_cast %42 : vector<128xf32> to vector<1x128xf32>
    %44 = arith.mulf %41, %41 : vector<8x128xf32>
    %cst_16 = arith.constant dense<0.000000e+00> : vector<128xf32>
    %45 = vector.multi_reduction <add>, %44, %cst_16 [0] : vector<8x128xf32> to vector<128xf32>
    %46 = vector.shape_cast %45 : vector<128xf32> to vector<1x128xf32>
    %cst_17 = arith.constant 1.250000e-01 : f32
    %47 = vector.broadcast %cst_17 : f32 to vector<1x128xf32>
    %48 = arith.mulf %43, %47 : vector<1x128xf32>
    %cst_18 = arith.constant 1.250000e-01 : f32
    %49 = vector.broadcast %cst_18 : f32 to vector<1x128xf32>
    %50 = arith.mulf %46, %49 : vector<1x128xf32>
    %51 = arith.mulf %48, %48 : vector<1x128xf32>
    %52 = arith.subf %50, %51 : vector<1x128xf32>
    %cst_19 = arith.constant 0.000000e+00 : f32
    %53 = vector.broadcast %cst_19 : f32 to vector<1x128xf32>
    %54 = arith.maximumf %52, %53 : vector<1x128xf32>
    %55 = vector.broadcast %48 : vector<1x128xf32> to vector<8x128xf32>
    %56 = arith.subf %41, %55 : vector<8x128xf32>
    %cst_20 = arith.constant 9.99999974E-6 : f32
    %57 = vector.broadcast %cst_20 : f32 to vector<1x128xf32>
    %58 = arith.addf %54, %57 : vector<1x128xf32>
    %59 = math.rsqrt %58 : vector<1x128xf32>
    %60 = vector.broadcast %59 : vector<1x128xf32> to vector<8x128xf32>
    %61 = arith.mulf %56, %60 : vector<8x128xf32>
    %62 = vector.broadcast %36 : vector<1x128xf32> to vector<8x128xf32>
    %63 = arith.mulf %61, %62 : vector<8x128xf32>
    %64 = vector.broadcast %37 : vector<1x128xf32> to vector<8x128xf32>
    %65 = arith.addf %63, %64 : vector<8x128xf32>
    %cst_21 = arith.constant 0.000000e+00 : f32
    %66 = vector.broadcast %cst_21 : f32 to vector<8x128xf32>
    %67 = arith.maximumf %65, %66 : vector<8x128xf32>
    %68 = vector.extract_strided_slice %0 {offsets = [6, 0], sizes = [1, 128], strides = [1, 1]} : vector<16x128xf32> to vector<1x128xf32>
    %69 = vector.extract_strided_slice %0 {offsets = [7, 0], sizes = [1, 128], strides = [1, 1]} : vector<16x128xf32> to vector<1x128xf32>
    %70 = vector.extract_strided_slice %0 {offsets = [8, 0], sizes = [1, 128], strides = [1, 1]} : vector<16x128xf32> to vector<1x128xf32>
    %c0_22 = arith.constant 0 : index
    %c0_23 = arith.constant 0 : index
    %71 = vector.load %arg3[%c0_22, %c0_23] : memref<128x128xf32, #tpu.memory_space<vmem>>, vector<128x128xf32>
    %cst_24 = arith.constant dense<0.000000e+00> : vector<8x128xf32>
    %72 = tpu.matmul %67, %71, %cst_24 {dimension_numbers = #tpu.dot_dimension_numbers<[1], [0], [0], [1], [0, 0, 1, 1], [], []>} : vector<8x128xf32>, vector<128x128xf32>, vector<8x128xf32> -> vector<8x128xf32>
    %73 = vector.broadcast %68 : vector<1x128xf32> to vector<8x128xf32>
    %74 = arith.addf %72, %73 : vector<8x128xf32>
    %cst_25 = arith.constant dense<0.000000e+00> : vector<128xf32>
    %75 = vector.multi_reduction <add>, %74, %cst_25 [0] : vector<8x128xf32> to vector<128xf32>
    %76 = vector.shape_cast %75 : vector<128xf32> to vector<1x128xf32>
    %77 = arith.mulf %74, %74 : vector<8x128xf32>
    %cst_26 = arith.constant dense<0.000000e+00> : vector<128xf32>
    %78 = vector.multi_reduction <add>, %77, %cst_26 [0] : vector<8x128xf32> to vector<128xf32>
    %79 = vector.shape_cast %78 : vector<128xf32> to vector<1x128xf32>
    %cst_27 = arith.constant 1.250000e-01 : f32
    %80 = vector.broadcast %cst_27 : f32 to vector<1x128xf32>
    %81 = arith.mulf %76, %80 : vector<1x128xf32>
    %cst_28 = arith.constant 1.250000e-01 : f32
    %82 = vector.broadcast %cst_28 : f32 to vector<1x128xf32>
    %83 = arith.mulf %79, %82 : vector<1x128xf32>
    %84 = arith.mulf %81, %81 : vector<1x128xf32>
    %85 = arith.subf %83, %84 : vector<1x128xf32>
    %cst_29 = arith.constant 0.000000e+00 : f32
    %86 = vector.broadcast %cst_29 : f32 to vector<1x128xf32>
    %87 = arith.maximumf %85, %86 : vector<1x128xf32>
    %88 = vector.broadcast %81 : vector<1x128xf32> to vector<8x128xf32>
    %89 = arith.subf %74, %88 : vector<8x128xf32>
    %cst_30 = arith.constant 9.99999974E-6 : f32
    %90 = vector.broadcast %cst_30 : f32 to vector<1x128xf32>
    %91 = arith.addf %87, %90 : vector<1x128xf32>
    %92 = math.rsqrt %91 : vector<1x128xf32>
    %93 = vector.broadcast %92 : vector<1x128xf32> to vector<8x128xf32>
    %94 = arith.mulf %89, %93 : vector<8x128xf32>
    %95 = vector.broadcast %69 : vector<1x128xf32> to vector<8x128xf32>
    %96 = arith.mulf %94, %95 : vector<8x128xf32>
    %97 = vector.broadcast %70 : vector<1x128xf32> to vector<8x128xf32>
    %98 = arith.addf %96, %97 : vector<8x128xf32>
    %cst_31 = arith.constant 0.000000e+00 : f32
    %99 = vector.broadcast %cst_31 : f32 to vector<8x128xf32>
    %100 = arith.maximumf %98, %99 : vector<8x128xf32>
    %c0_32 = arith.constant 0 : index
    %c0_33 = arith.constant 0 : index
    %101 = vector.load %arg4[%c0_32, %c0_33] : memref<128x128xf32, #tpu.memory_space<vmem>>, vector<128x128xf32>
    %cst_34 = arith.constant dense<0.000000e+00> : vector<8x128xf32>
    %102 = tpu.matmul %100, %101, %cst_34 {dimension_numbers = #tpu.dot_dimension_numbers<[1], [0], [0], [1], [0, 0, 1, 1], [], []>} : vector<8x128xf32>, vector<128x128xf32>, vector<8x128xf32> -> vector<8x128xf32>
    %103 = vector.extract_strided_slice %0 {offsets = [9, 0], sizes = [1, 128], strides = [1, 1]} : vector<16x128xf32> to vector<1x128xf32>
    %104 = vector.broadcast %103 : vector<1x128xf32> to vector<8x128xf32>
    %105 = arith.addf %102, %104 : vector<8x128xf32>
    %106 = math.tanh %105 : vector<8x128xf32>
    %cst_35 = arith.constant 1.000000e+01 : f32
    %107 = vector.broadcast %cst_35 : f32 to vector<8x128xf32>
    %108 = arith.mulf %107, %106 : vector<8x128xf32>
    %c0_36 = arith.constant 0 : index
    %c0_37 = arith.constant 0 : index
    %109 = vector.load %arg6[%c0_36, %c0_37] : memref<8x128xf32, #tpu.memory_space<vmem>>, vector<8x128xf32>
    tpu.vector_store %arg6[%c0_36, %c0_37], %108 {strides = array<i32>} : memref<8x128xf32, #tpu.memory_space<vmem>>, vector<8x128xf32>,
    return
  }
}

</mosaic_0001>

<bundles_post_ra>
// kernel: tpu_custom_call.1
= control target key start
LH: loop header
LB: loop body
LE: loop exit
PB: predicated region body
PF: predicated region fallthrough
CT: control target
= control target key end

     0   :  { %11 = vsyncpa [#allocation3], 0  ;;  %s683_s0 = inlined_call_operand.hbm [shape: f32[8,128], index: 0, kind: input, shape index: {}]   ;;  %s684_s1 = inlined_call_operand.hbm [shape: f32[128,128], index: 1, kind: input, shape index: {}]   ;;  %s685_s2 = inlined_call_operand.hbm [shape: f32[128,128], index: 2, kind: input, shape index: {}]   ;;  %s686_s3 = inlined_call_operand.hbm [shape: f32[128,128], index: 3, kind: input, shape index: {}]   ;;  %s687_s4 = inlined_call_operand.hbm [shape: f32[128,128], index: 4, kind: input, shape index: {}]   ;;  %s688_s5 = inlined_call_operand.hbm [shape: f32[16,128], index: 5, kind: input, shape index: {}]   ;;  %s689_s6 = inlined_call_operand.hbm [shape: f32[8,128], index: 6, kind: output, shape index: {}]  }
   0x1   :  { %12 = vsyncpa [#allocation6], 0 }
   0x2   :  { %13 = vsyncpa [#allocation9], 0 }
   0x3   :  { %14 = vsyncpa [#allocation12], 0  ;;  %s31_s23 = sshll.u32 %s684_s1, 4  ;;  %s32_s23 = int_to_ptr.hbm [resolvable:$true] %s31_s23 }
   0x4   :  { %15 = vsyncpa [#allocation4], 0  ;;  %s593_s24 = smov [#allocation5]   ;;  %s57_s28 = sshll.u32 %s686_s3, 4  ;;  %s58_s28 = int_to_ptr.hbm [resolvable:$true] %s57_s28 }
   0x5   :  { %s33_s25 = sshll.u32 %s593_s24, 4  ;;  %s594_s29 = smov 128   ;;  %s34_s25 = int_to_ptr.vmem [resolvable:$true] %s33_s25 }
   0x6   :  { %s595_s30 = smov 8   ;;  %s596_s7 = smov [#allocation8]  }
   0x7   :  { %39 = dma.hbm_to_vmem [thread:$0]  %s32_s23, 2048, %s34_s25, [#allocation6], %s594_s29, %s594_s29, %s595_s30  }
   0x8   :  { %s59_s8 = sshll.u32 %s596_s7, 4  ;;  %s21_s10 = sshll.u32 %s683_s0, 4  ;;  %s60_s8 = int_to_ptr.vmem [resolvable:$true] %s59_s8  ;;  %s22_s10 = int_to_ptr.hbm [resolvable:$true] %s21_s10 }
   0x9   :  { %65 = dma.hbm_to_vmem [thread:$0]  %s58_s28, 2048, %s60_s8, [#allocation9], %s594_s29, %s594_s29, %s595_s30  }
   0xa   :  { %s44_s12 = sshll.u32 %s685_s2, 4  ;;  %s597_s13 = smov [#allocation2]   ;;  %s45_s12 = int_to_ptr.hbm [resolvable:$true] %s44_s12 }
   0xb   :  { %s23_s14 = sshll.u32 %s597_s13, 4  ;;  %s598_s15 = smov [#allocation7]   ;;  %s24_s14 = int_to_ptr.vmem [resolvable:$true] %s23_s14 }
   0xc   :  { %26 = dma.hbm_to_vmem [thread:$0]  %s22_s10, 128, %s24_s14, [#allocation3]  }
   0xd   :  { %s46_s16 = sshll.u32 %s598_s15, 4  ;;  %s70_s0 = sshll.u32 %s687_s4, 4  ;;  %s47_s16 = int_to_ptr.vmem [resolvable:$true] %s46_s16  ;;  %s71_s0 = int_to_ptr.hbm [resolvable:$true] %s70_s0 }
   0xe   :  { %52 = dma.hbm_to_vmem [thread:$0]  %s45_s12, 2048, %s47_s16, [#allocation6], %s594_s29, %s594_s29, %s595_s30  }
   0xf   :  { %s83_s2 = sshll.u32 %s688_s5, 4  ;;  %s599_s21 = smov [#allocation10]   ;;  %s84_s2 = int_to_ptr.hbm [resolvable:$true] %s83_s2 }
  0x10   :  { %s72_s22 = sshll.u32 %s599_s21, 4  ;;  %s600_s23 = smov [#allocation11]   ;;  %s73_s22 = int_to_ptr.vmem [resolvable:$true] %s72_s22 }
  0x11   :  { %78 = dma.hbm_to_vmem [thread:$0]  %s71_s0, 2048, %s73_s22, [#allocation9], %s594_s29, %s594_s29, %s595_s30  }
  0x12   :  { %s85_s4 = sshll.u32 %s600_s23, 4  ;;  %s86_s4 = int_to_ptr.vmem [resolvable:$true] %s85_s4 }
  0x13   :  { %91 = dma.hbm_to_vmem [thread:$0]  %s84_s2, 256, %s86_s4, [#allocation12], %s594_s29, %s594_s29, %s595_s30  }
  0x14   :  { %583 = dma.done.wait [#allocation3], 128  }
  0x15   :  { %584 = vsyncadd [#allocation3], 4294967168 }
  0x16   :  { %585 = dma.done.wait [#allocation6], 4096  }
  0x17   :  { %586 = vsyncadd [#allocation6], 4294963200 }
  0x18   :  { %587 = dma.done.wait [#allocation9], 4096  }
  0x19   :  { %588 = vsyncadd [#allocation9], 4294963200 }
  0x1a   :  { %589 = dma.done.wait [#allocation12], 256  }
  0x1b   :  { %590 = vsyncadd [#allocation12], 4294967040  ;;  %v134_v0 = vld [vmem:[#allocation5 + $0x78] sm:$0xff]  ;;  %v133_v1 = vld [vmem:[#allocation5 + $0x70] sm:$0xff]  ;;  %s601_s5 = smov [#allocation13]   ;;  %s385_s27 = sshll.u32 %s689_s6, 4  ;;  %s386_s27 = int_to_ptr.hbm [resolvable:$true] %s385_s27 }
  0x1c   :  { %136 = vmatpush.msra.mxu0 %v134_v0  ;;  %v132_v2 = vld [vmem:[#allocation5 + $0x68] sm:$0xff]  ;;  %v131_v3 = vld [vmem:[#allocation5 + $0x60] sm:$0xff]  ;;  %v130_v4 = vld [vmem:[#allocation5 + $0x58] sm:$0xff]  ;;  %s383_s24 = sshll.u32 %s601_s5, 4  ;;  %s384_s24 = int_to_ptr.vmem [resolvable:$true] %s383_s24 }
  0x1d   :  { %v129_v5 = vld [vmem:[#allocation5 + $0x50] sm:$0xff]  ;;  %v128_v6 = vld [vmem:[#allocation5 + $0x48] sm:$0xff]  ;;  %v127_v7 = vld [vmem:[#allocation5 + $0x40] sm:$0xff] }
  0x1e   :  { %137 = vmatpush.msra.mxu0 %v133_v1  ;;  %v126_v8 = vld [vmem:[#allocation5 + $0x38] sm:$0xff]  ;;  %v125_v9 = vld [vmem:[#allocation5 + $0x30] sm:$0xff]  ;;  %v124_v10 = vld [vmem:[#allocation5 + $0x28] sm:$0xff] }
  0x1f   :  { %v123_v11 = vld [vmem:[#allocation5 + $0x20] sm:$0xff]  ;;  %v122_v12 = vld [vmem:[#allocation5 + $0x18] sm:$0xff]  ;;  %v121_v13 = vld [vmem:[#allocation5 + $0x10] sm:$0xff] }
  0x20   :  { %138 = vmatpush.msra.mxu0 %v132_v2  ;;  %v120_v14 = vld [vmem:[#allocation5 + $0x8] sm:$0xff]  ;;  %v119_v15 = vld [vmem:[#allocation5] sm:$0xff]  ;;  %v118_v16 = vld [vmem:[#allocation2] sm:$0xff] }
  0x21   :  { %v207_v17 = vld [vmem:[#allocation7 + $0x78] sm:$0xff]  ;;  %v206_v18 = vld [vmem:[#allocation7 + $0x70] sm:$0xff]  ;;  %v205_v19 = vld [vmem:[#allocation7 + $0x68] sm:$0xff] }
  0x22   :  { %139 = vmatpush.msra.mxu0 %v131_v3  ;;  %209 = vmatpush.msra.mxu1 %v207_v17  ;;  %v204_v20 = vld [vmem:[#allocation7 + $0x60] sm:$0xff]  ;;  %v203_v21 = vld [vmem:[#allocation7 + $0x58] sm:$0xff]  ;;  %v202_v22 = vld [vmem:[#allocation7 + $0x50] sm:$0xff] }
  0x23   :  { %v670_v23 = vld [vmem:[#allocation11] sm:$0xff]  ;;  %v201_v24 = vld [vmem:[#allocation7 + $0x48] sm:$0xff]  ;;  %v199_v27 = vld [vmem:[#allocation7 + $0x38] sm:$0xff] }
  0x24   :  { %140 = vmatpush.msra.mxu0 %v130_v4  ;;  %210 = vmatpush.msra.mxu1 %v206_v18  ;;  %v135_v25 = vperm.slane %v670_v23, 0  ;;  %v200_v26 = vld [vmem:[#allocation7 + $0x40] sm:$0xff]  ;;  %v198_v30 = vld [vmem:[#allocation7 + $0x30] sm:$0xff]  ;;  %v197_v33 = vld [vmem:[#allocation7 + $0x28] sm:$0xff]  ;;  %v187_v63 = vperm.slane %v670_v23, 1  ;;  %v189_v2 = vperm.slane %v670_v23, 2 }
  0x25   :  { %v196_v36 = vld [vmem:[#allocation7 + $0x20] sm:$0xff]  ;;  %v195_v39 = vld [vmem:[#allocation7 + $0x18] sm:$0xff]  ;;  %v194_v42 = vld [vmem:[#allocation7 + $0x10] sm:$0xff] }
  0x26   :  { %141 = vmatpush.msra.mxu0 %v129_v5  ;;  %211 = vmatpush.msra.mxu1 %v205_v19  ;;  %v193_v44 = vld [vmem:[#allocation7 + $0x8] sm:$0xff]  ;;  %v192_v47 = vld [vmem:[#allocation7] sm:$0xff]  ;;  %v271_v18 = vld [vmem:[#allocation8 + $0x30] sm:$0xff] }
  0x28   :  { %142 = vmatpush.msra.mxu0 %v128_v6  ;;  %212 = vmatpush.msra.mxu1 %v204_v20  ;;  %v280_v6 = vld [vmem:[#allocation8 + $0x78] sm:$0xff] }
  0x29   :  { %282 = vmatpush.msra.mxu2 %v280_v6 }
  0x2a   :  { %143 = vmatpush.msra.mxu0 %v127_v7  ;;  %213 = vmatpush.msra.mxu1 %v203_v21  ;;  %v279_v7 = vld [vmem:[#allocation8 + $0x70] sm:$0xff]  ;;  %v270_v21 = vld [vmem:[#allocation8 + $0x28] sm:$0xff] }
  0x2b   :  { %283 = vmatpush.msra.mxu2 %v279_v7  ;;  %v344_v7 = vld [vmem:[#allocation10 + $0x30] sm:$0xff] }
  0x2c   :  { %144 = vmatpush.msra.mxu0 %v126_v8  ;;  %214 = vmatpush.msra.mxu1 %v202_v22  ;;  %v278_v8 = vld [vmem:[#allocation8 + $0x68] sm:$0xff] }
  0x2d   :  { %284 = vmatpush.msra.mxu2 %v278_v8 }
  0x2e   :  { %145 = vmatpush.msra.mxu0 %v125_v9  ;;  %215 = vmatpush.msra.mxu1 %v201_v24  ;;  %v277_v9 = vld [vmem:[#allocation8 + $0x60] sm:$0xff] }
  0x2f   :  { %285 = vmatpush.msra.mxu2 %v277_v9 }
  0x30   :  { %146 = vmatpush.msra.mxu0 %v124_v10  ;;  %216 = vmatpush.msra.mxu1 %v200_v26  ;;  %v276_v10 = vld [vmem:[#allocation8 + $0x58] sm:$0xff] }
  0x31   :  { %286 = vmatpush.msra.mxu2 %v276_v10  ;;  %v343_v10 = vld [vmem:[#allocation10 + $0x28] sm:$0xff] }
  0x32   :  { %147 = vmatpush.msra.mxu0 %v123_v11  ;;  %217 = vmatpush.msra.mxu1 %v199_v27  ;;  %v275_v11 = vld [vmem:[#allocation8 + $0x50] sm:$0xff] }
  0x33   :  { %287 = vmatpush.msra.mxu2 %v275_v11 }
  0x34   :  { %148 = vmatpush.msra.mxu0 %v122_v12  ;;  %218 = vmatpush.msra.mxu1 %v198_v30  ;;  %v274_v12 = vld [vmem:[#allocation8 + $0x48] sm:$0xff] }
  0x35   :  { %288 = vmatpush.msra.mxu2 %v274_v12 }
  0x36   :  { %149 = vmatpush.msra.mxu0 %v121_v13  ;;  %219 = vmatpush.msra.mxu1 %v197_v33  ;;  %v208_v13 = vperm.slane %v670_v23, 3  ;;  %v266_v33 = vld [vmem:[#allocation8 + $0x8] sm:$0xff] }
  0x38   :  { %150 = vmatpush.msra.mxu0 %v120_v14  ;;  %220 = vmatpush.msra.mxu1 %v196_v36  ;;  %v273_v14 = vld [vmem:[#allocation8 + $0x40] sm:$0xff] }
  0x39   :  { %289 = vmatpush.msra.mxu2 %v273_v14  ;;  %v265_v36 = vld [vmem:[#allocation8] sm:$0xff] }
  0x3a   :  { %151 = vmatpush.msra.mxu0 %v119_v15  ;;  %221 = vmatpush.msra.mxu1 %v195_v39  ;;  %v272_v15 = vld [vmem:[#allocation8 + $0x38] sm:$0xff] }
  0x3b   :  { %152 = vmatmul.f32.vlgmr.msra.gmra.mxu0 %v118_v16  ;;  %290 = vmatpush.msra.mxu2 %v272_v15 }
  0x3c   :  { %222 = vmatpush.msra.mxu1 %v194_v42 }
  0x3d   :  { %291 = vmatpush.msra.mxu2 %v271_v18 }
  0x3e   :  { %223 = vmatpush.msra.mxu1 %v193_v44 }
  0x3f   :  { %292 = vmatpush.msra.mxu2 %v270_v21  ;;  %v339_v21 = vld [vmem:[#allocation10 + $0x8] sm:$0xff] }
  0x40   :  { %224 = vmatpush.msra.mxu1 %v192_v47 }
  0xb8   :  { %v153_v28 = vpop.f32.mrf.mxu0 }
  0xb9   :  { %v154_v29 = vadd.f32 %v153_v28, %v135_v25  ;;  %v269_v25 = vld [vmem:[#allocation8 + $0x20] sm:$0xff]  ;;  %v268_v28 = vld [vmem:[#allocation8 + $0x18] sm:$0xff] }
  0xba   :  { %293 = vmatpush.msra.mxu2 %v269_v25  ;;  %v338_v25 = vld [vmem:[#allocation10] sm:$0xff] }
  0xbb   :  { %v156_v31 = vrot.slane %v154_v29, 4  ;;  %v162_v32 = vmul.f32 %v154_v29, %v154_v29 }
  0xbc   :  { %294 = vmatpush.msra.mxu2 %v268_v28 }
  0xbd   :  { %v157_v34 = vadd.f32 %v156_v31, %v154_v29  ;;  %v163_v35 = vrot.slane %v162_v32, 4  ;;  %v267_v31 = vld [vmem:[#allocation8 + $0x10] sm:$0xff] }
  0xbe   :  { %295 = vmatpush.msra.mxu2 %v267_v31 }
  0xbf   :  { %v158_v37 = vrot.slane %v157_v34, 2  ;;  %v164_v38 = vadd.f32 %v163_v35, %v162_v32 }
  0xc0   :  { %296 = vmatpush.msra.mxu2 %v266_v33 }
  0xc1   :  { %v159_v40 = vadd.f32 %v158_v37, %v157_v34  ;;  %v165_v41 = vrot.slane %v164_v38, 2 }
  0xc2   :  { %297 = vmatpush.msra.mxu2 %v265_v36 }
  0xc3   :  { %v166_v43 = vadd.f32 %v165_v41, %v164_v38  ;;  %v160_v45 = vrot.slane %v159_v40, 1 }
  0xc5   :  { %v167_v46 = vrot.slane %v166_v43, 1  ;;  %v161_v48 = vadd.f32 %v160_v45, %v159_v40 }
  0xc7   :  { %v168_v49 = vadd.f32 %v167_v46, %v166_v43  ;;  %v169_v50 = vmul.f32 0.125, %v161_v48 }
  0xc9   :  { %v170_v51 = vmul.f32 0.125, %v168_v49  ;;  %v171_v52 = vmul.f32 %v169_v50, %v169_v50  ;;  %v174_v62 = vsub.f32 %v154_v29, %v169_v50 }
  0xcb   :  { %v172_v53 = vsub.f32 %v170_v51, %v171_v52  ;;  %v260_v52 = vperm.slane %v670_v23, 4 }
  0xcd   :  { %v173_v54 = vmax.f32 %v172_v53, 0.0 }
  0xcf   :  { %v175_v55 = vadd.f32 1e-05, %v173_v54 }
  0xd1   :  { %407 = vrsqrt.f32 %v175_v55  ;;  %vm182_vm1 = vweird.f32 %v175_v55 }
  0xd7   :  { %v408_v56 = vpop.eup %407 }
  0xd8   :  { %v177_v57 = vmul.f32 %v408_v56, %v175_v55  ;;  %vm183_vm0 = vweird.f32 %v408_v56  ;;  %v262_v55 = vperm.slane %v670_v23, 5 }
  0xd9   :  { %vm184_vm2 = vmor %vm182_vm1, %vm183_vm0 }
  0xda   :  { %v178_v58 = vmul.f32 %v408_v56, %v177_v57 }
  0xdc   :  { %v179_v59 = vmul.f32 0.5, %v178_v58 }
  0xde   :  { %v180_v60 = vsub.f32 1.5, %v179_v59  ;;  %v353_v59 = vld [vmem:[#allocation10 + $0x78] sm:$0xff] }
  0xdf   :  { %355 = vmatpush.msra.mxu3 %v353_v59 }
  0xe0   :  { %v181_v61 = vmul.f32 %v408_v56, %v180_v60  ;;  %v352_v60 = vld [vmem:[#allocation10 + $0x70] sm:$0xff] }
  0xe1   :  { %356 = vmatpush.msra.mxu3 %v352_v60 }
  0xe2   :  { %v185_v0 = vsel %vm184_vm2, %v408_v56, %v181_v61  ;;  %v351_v61 = vld [vmem:[#allocation10 + $0x68] sm:$0xff] }
  0xe3   :  { %v186_v1 = vmul.f32 %v185_v0, %v174_v62  ;;  %v350_v62 = vld [vmem:[#allocation10 + $0x60] sm:$0xff]  ;;  %357 = vmatpush.msra.mxu3 %v351_v61  ;;  %v348_v0 = vld [vmem:[#allocation10 + $0x50] sm:$0xff] }
  0xe5   :  { %v188_v3 = vmul.f32 %v187_v63, %v186_v1  ;;  %v349_v63 = vld [vmem:[#allocation10 + $0x58] sm:$0xff]  ;;  %358 = vmatpush.msra.mxu3 %v350_v62  ;;  %v347_v1 = vld [vmem:[#allocation10 + $0x48] sm:$0xff] }
  0xe7   :  { %v190_v4 = vadd.f32 %v189_v2, %v188_v3  ;;  %359 = vmatpush.msra.mxu3 %v349_v63  ;;  %v281_v2 = vperm.slane %v670_v23, 6  ;;  %v346_v3 = vld [vmem:[#allocation10 + $0x40] sm:$0xff] }
  0xe9   :  { %v191_v5 = vmax.f32 %v190_v4, 0.0  ;;  %360 = vmatpush.msra.mxu3 %v348_v0  ;;  %v345_v4 = vld [vmem:[#allocation10 + $0x38] sm:$0xff] }
  0xeb   :  { %225 = vmatmul.f32.vlgmr.msra.gmra.mxu1 %v191_v5  ;;  %361 = vmatpush.msra.mxu3 %v347_v1 }
  0xed   :  { %362 = vmatpush.msra.mxu3 %v346_v3 }
  0xef   :  { %363 = vmatpush.msra.mxu3 %v345_v4 }
  0xf1   :  { %364 = vmatpush.msra.mxu3 %v344_v7 }
  0xf3   :  { %365 = vmatpush.msra.mxu3 %v343_v10 }
 0x168   :  { %v226_v16 = vpop.f32.mrf.mxu1 }
 0x169   :  { %v227_v17 = vadd.f32 %v226_v16, %v208_v13  ;;  %v342_v13 = vld [vmem:[#allocation10 + $0x20] sm:$0xff]  ;;  %v341_v16 = vld [vmem:[#allocation10 + $0x18] sm:$0xff] }
 0x16a   :  { %366 = vmatpush.msra.mxu3 %v342_v13 }
 0x16b   :  { %v229_v19 = vrot.slane %v227_v17, 4  ;;  %v235_v20 = vmul.f32 %v227_v17, %v227_v17 }
 0x16c   :  { %367 = vmatpush.msra.mxu3 %v341_v16 }
 0x16d   :  { %v230_v22 = vadd.f32 %v229_v19, %v227_v17  ;;  %v236_v24 = vrot.slane %v235_v20, 4  ;;  %v340_v19 = vld [vmem:[#allocation10 + $0x10] sm:$0xff] }
 0x16e   :  { %368 = vmatpush.msra.mxu3 %v340_v19 }
 0x16f   :  { %v231_v26 = vrot.slane %v230_v22, 2  ;;  %v237_v27 = vadd.f32 %v236_v24, %v235_v20 }
 0x170   :  { %369 = vmatpush.msra.mxu3 %v339_v21 }
 0x171   :  { %v232_v29 = vadd.f32 %v231_v26, %v230_v22  ;;  %v238_v30 = vrot.slane %v237_v27, 2 }
 0x172   :  { %370 = vmatpush.msra.mxu3 %v338_v25 }
 0x173   :  { %v239_v32 = vadd.f32 %v238_v30, %v237_v27  ;;  %v233_v34 = vrot.slane %v232_v29, 1 }
 0x175   :  { %v240_v35 = vrot.slane %v239_v32, 1  ;;  %v234_v37 = vadd.f32 %v233_v34, %v232_v29 }
 0x177   :  { %v241_v38 = vadd.f32 %v240_v35, %v239_v32  ;;  %v242_v39 = vmul.f32 0.125, %v234_v37 }
 0x179   :  { %v243_v40 = vmul.f32 0.125, %v241_v38  ;;  %v244_v41 = vmul.f32 %v242_v39, %v242_v39  ;;  %v247_v51 = vsub.f32 %v227_v17, %v242_v39  ;;  %v117_v39 = vld [vmem:[#allocation11 + $0x8] sm:$0xff] }
 0x17b   :  { %v245_v42 = vsub.f32 %v243_v40, %v244_v41 }
 0x17d   :  { %v246_v43 = vmax.f32 %v245_v42, 0.0  ;;  %v333_v42 = vperm.slane %v670_v23, 7 }
 0x17f   :  { %v248_v44 = vadd.f32 1e-05, %v246_v43 }
 0x181   :  { %409 = vrsqrt.f32 %v248_v44  ;;  %vm255_vm4 = vweird.f32 %v248_v44 }
 0x187   :  { %v410_v45 = vpop.eup %409 }
 0x188   :  { %v250_v46 = vmul.f32 %v410_v45, %v248_v44  ;;  %vm256_vm3 = vweird.f32 %v410_v45 }
 0x189   :  { %vm257_vm5 = vmor %vm255_vm4, %vm256_vm3 }
 0x18a   :  { %v251_v47 = vmul.f32 %v410_v45, %v250_v46 }
 0x18c   :  { %v252_v48 = vmul.f32 0.5, %v251_v47 }
 0x18e   :  { %v253_v49 = vsub.f32 1.5, %v252_v48 }
 0x190   :  { %v254_v50 = vmul.f32 %v410_v45, %v253_v49  ;;  %v354_v49 = vperm.slane %v117_v39, 1 }
 0x192   :  { %v258_v53 = vsel %vm257_vm5, %v410_v45, %v254_v50  ;;  %v335_v45 = vperm.slane %v117_v39, 0 }
 0x193   :  { %v259_v54 = vmul.f32 %v258_v53, %v247_v51 }
 0x195   :  { %v261_v56 = vmul.f32 %v260_v52, %v259_v54 }
 0x197   :  { %v263_v57 = vadd.f32 %v262_v55, %v261_v56 }
 0x199   :  { %v264_v58 = vmax.f32 %v263_v57, 0.0 }
 0x19b   :  { %298 = vmatmul.f32.vlgmr.msra.gmra.mxu2 %v264_v58 }
 0x21e   :  { %v299_v5 = vpop.f32.mrf.mxu2 }
 0x21f   :  { %v300_v6 = vadd.f32 %v299_v5, %v281_v2 }
 0x221   :  { %v302_v8 = vrot.slane %v300_v6, 4  ;;  %v308_v9 = vmul.f32 %v300_v6, %v300_v6 }
 0x223   :  { %v303_v11 = vadd.f32 %v302_v8, %v300_v6  ;;  %v309_v12 = vrot.slane %v308_v9, 4 }
 0x225   :  { %v304_v14 = vrot.slane %v303_v11, 2  ;;  %v310_v15 = vadd.f32 %v309_v12, %v308_v9 }
 0x227   :  { %v305_v17 = vadd.f32 %v304_v14, %v303_v11  ;;  %v311_v18 = vrot.slane %v310_v15, 2 }
 0x229   :  { %v312_v20 = vadd.f32 %v311_v18, %v310_v15  ;;  %v306_v22 = vrot.slane %v305_v17, 1 }
 0x22b   :  { %v313_v24 = vrot.slane %v312_v20, 1  ;;  %v307_v26 = vadd.f32 %v306_v22, %v305_v17 }
 0x22d   :  { %v314_v27 = vadd.f32 %v313_v24, %v312_v20  ;;  %v315_v28 = vmul.f32 0.125, %v307_v26 }
 0x22f   :  { %v316_v29 = vmul.f32 0.125, %v314_v27  ;;  %v317_v30 = vmul.f32 %v315_v28, %v315_v28  ;;  %v320_v41 = vsub.f32 %v300_v6, %v315_v28 }
 0x231   :  { %v318_v31 = vsub.f32 %v316_v29, %v317_v30 }
 0x233   :  { %v319_v32 = vmax.f32 %v318_v31, 0.0 }
 0x235   :  { %v321_v33 = vadd.f32 1e-05, %v319_v32 }
 0x237   :  { %411 = vrsqrt.f32 %v321_v33  ;;  %vm328_vm7 = vweird.f32 %v321_v33 }
 0x23d   :  { %v412_v34 = vpop.eup %411 }
 0x23e   :  { %v323_v35 = vmul.f32 %v412_v34, %v321_v33  ;;  %vm329_vm6 = vweird.f32 %v412_v34 }
 0x23f   :  { %vm330_vm8 = vmor %vm328_vm7, %vm329_vm6 }
 0x240   :  { %v324_v36 = vmul.f32 %v412_v34, %v323_v35 }
 0x242   :  { %v325_v37 = vmul.f32 0.5, %v324_v36 }
 0x244   :  { %v326_v38 = vsub.f32 1.5, %v325_v37 }
 0x246   :  { %v327_v40 = vmul.f32 %v412_v34, %v326_v38 }
 0x248   :  { %v331_v43 = vsel %vm330_vm8, %v412_v34, %v327_v40 }
 0x249   :  { %v332_v44 = vmul.f32 %v331_v43, %v320_v41 }
 0x24b   :  { %v334_v46 = vmul.f32 %v333_v42, %v332_v44 }
 0x24d   :  { %v336_v47 = vadd.f32 %v335_v45, %v334_v46 }
 0x24f   :  { %v337_v48 = vmax.f32 %v336_v47, 0.0 }
 0x251   :  { %371 = vmatmul.f32.vlgmr.msra.gmra.mxu3 %v337_v48 }
 0x2d4   :  { %v372_v50 = vpop.f32.mrf.mxu3 }
 0x2d5   :  { %v373_v51 = vadd.f32 %v372_v50, %v354_v49 }
 0x2d7   :  { %413 = vtanh.f32 %v373_v51 }
 0x2dd   :  { %v414_v52 = vpop.eup %413 }
 0x2de   :  { %v376_v53 = vmul.f32 10.0, %v414_v52 }
 0x2e0   :  { %377 = vst [vmem:[#allocation13] sm:$0xff] %v376_v53 }
 0x2e1   :  { %388 = dma.vmem_to_hbm [thread:$0]  %s384_s24, 128, %s386_s27, [#allocation4]  }
 0x2e2   :  { %591 = dma.done.wait [#allocation4], 128  }
 0x2e3   :  { %592 = vsyncadd [#allocation4], 4294967168 }
 0x2e4   :  { %393 = vsyncpa [#allocation3], 1 }
 0x2e5   :  { %394 = vsyncpa [#allocation6], 1 }
 0x2e6   :  { %395 = vsyncpa [#allocation9], 1 }
 0x2e7   :  { %396 = vsyncpa [#allocation12], 1 }
 0x2e8   :  { %397 = vsyncpa [#allocation4], 1 }

</bundles_post_ra>
